<compile_context>
chip_gen: v6e
topology: v6e:2x2x1
jax: 0.10.0
libtpu: 0.0.40
codegen_flags: <defaults>
</compile_context>

<pallas_src>
import math

import jax
import jax.numpy as jnp
from jax.experimental import pallas as pl
from jax.experimental.pallas import tpu as pltpu


def _tpu_vmem_capacity_bytes() -> int:
    """Physical VMEM per TensorCore; conservative (v7x-sized) fallback."""
    try:
        return int(pltpu.get_tpu_info().vmem_capacity_bytes)
    except Exception:
        return 64 << 20


def _plan_blocks(N, C, HW, itemsize, w_bytes, max_bn=16):
    """Pick (batch_block Bn, spatial tile T, vmem_limit_bytes).

    Double-buffered x-in + x-out tiles cost 4*itemsize*Bn*C*T bytes, plus
    2*w_bytes for the resident folded weight.  We take the largest lane-dense
    tile that fits a per-generation VMEM budget so each grid step moves as much
    data as possible (amortizing the ~600-cycle per-step overhead and keeping
    the DMA pipeline near the HBM roofline).
    """
    vmem_cap = _tpu_vmem_capacity_bytes()
    # Keep at least half of physical VMEM as headroom for compiler scratch:
    # 64 MiB budget on v5e/v6e (128 MiB physical), 32 MiB on v7x (64 MiB).
    soft_limit = min(vmem_cap // 2, 64 << 20)
    budget = soft_limit - 2 * w_bytes - (4 << 20)
    budget = max(budget, 4 * itemsize * C * min(HW, 128))  # never below one tile
    max_block_elems = budget // (4 * itemsize)              # Bn * C * T upper bound

    # Spatial tile: full extent if it fits with Bn=1, else the largest
    # multiple-of-128 divisor of HW that fits ((8,128) rule: last block dim
    # must be a multiple of 128 or the full extent).
    if C * HW <= max_block_elems:
        hw_tile = HW
    else:
        hw_tile = 0
        t = (min(max_block_elems // C, HW) // 128) * 128
        while t >= 128:
            if HW % t == 0:
                hw_tile = t
                break
            t -= 128
        if hw_tile == 0:
            # No legal lane-dense divisor fits the budget; fall back to the
            # full extent and grow the VMEM limit to cover it.
            # TODO(synk): masked remainder tiles for ragged HW at very large C.
            hw_tile = HW

    # Batch block: largest divisor of N within budget.  The kernel unrolls a
    # short static Python loop over it, so also cap the unroll length.
    bn_cap = max(1, min(N, max_bn, max_block_elems // (C * hw_tile)))
    bn = 1
    for d in range(bn_cap, 0, -1):
        if N % d == 0:
            bn = d
            break

    need = 2 * w_bytes + 4 * itemsize * bn * C * hw_tile + (8 << 20)
    vmem_limit = int(max(32 << 20, need))
    return bn, hw_tile, vmem_limit


def _make_kernel(precision):
    def graph_layer_kernel(w_ref, b_ref, x_ref, o_ref):
        """One (batch-block, spatial-tile) step of the folded GraphLayer forward.

        w_ref : VMEM (C, C)      folded weight (resident across the grid)
        b_ref : VMEM (C, 1)      folded bias, f32 (resident across the grid)
        x_ref : VMEM (Bn, C, T)  input tile
        o_ref : VMEM (Bn, C, T)  output tile
        """
        bn = x_ref.shape[0]
        for n in range(bn):  # short static unroll (Bn <= 16), LLO-visible
            y = jnp.dot(w_ref[...], x_ref[n],
                        preferred_element_type=jnp.float32,
                        precision=precision)
            o_ref[n] = (y + b_ref[...]).astype(o_ref.dtype)
    return graph_layer_kernel


def graph_layer_forward(x_nchw, conv_w, conv_b, op_logw):
    """NCHW in / NCHW out (output dtype == input dtype).

    Folds the affine edge graph into one effective (C, C) weight + (C,) bias on
    the host (tiny 4x4 math), then runs a single-matmul-per-tile Pallas kernel.
    """
    N, C, H, W = x_nchw.shape
    HW = H * W
    io_dtype = x_nchw.dtype
    x = x_nchw.reshape(N, C, HW)  # contiguous reshape: no HBM transpose traffic

    # --- host-side parameter glue (runs once) --------------------------------
    # Edge e: f_e(x) = ew[e,0]*(W_e x + b_e) + ew[e,1]*x = A_e x + c_e
    #   node1 = f_0(x)
    #   node2 = f_1(x) + f_2(node1) = (A_1 + A_2 A_0) x + (c_1 + A_2 c_0 + c_2)
    # NOTE: this exact fold holds because every op in op_dict is affine
    # (1x1 conv / identity); it reassociates the math, so results match the
    # sequential reference to ~1e-5, not bitwise.
    # TODO(synk): generic non-affine ops need a per-edge kernel path.
    hi = jax.lax.Precision.HIGHEST
    ew = jnp.exp(op_logw.astype(jnp.float32))                       # (3, 2)
    eye = jnp.eye(C, dtype=jnp.float32)
    A = ew[:, 0, None, None] * conv_w + ew[:, 1, None, None] * eye  # (3, C, C)
    c = ew[:, 0, None] * conv_b                                     # (3, C)
    A_eff = A[1] + jnp.matmul(A[2], A[0], precision=hi)             # (C, C)
    b_eff = c[1] + jnp.matmul(A[2], c[0], precision=hi) + c[2]      # (C,)
    # TODO(synk): for realistic channel counts, pad C to a multiple of 8 /
    # the MXU tile here so Mosaic does not re-pad every tile.
    w_eff = A_eff.astype(io_dtype)   # bf16 weight when x is bf16 (1-pass MXU)
    b_eff = b_eff[:, None]           # (C, 1) f32, added after f32 accumulation

    itemsize = jnp.dtype(io_dtype).itemsize
    bn, hw_tile, vmem_limit = _plan_blocks(
        N, C, HW, itemsize, w_bytes=C * C * itemsize)
    assert N % bn == 0 and HW % hw_tile == 0, "block planner must tile exactly"
    grid = (N // bn, HW // hw_tile)

    # Reference uses Precision.HIGHEST; replicate it on the f32 path.
    precision = hi if jnp.dtype(io_dtype) == jnp.float32 else None
    kernel = _make_kernel(precision)

    cost = pl.CostEstimate(
        flops=2 * N * C * C * HW,
        transcendentals=0,
        bytes_accessed=2 * N * C * HW * itemsize + C * C * itemsize + C * 4,
    )

    out = pl.pallas_call(
        kernel,
        out_shape=jax.ShapeDtypeStruct((N, C, HW), io_dtype),
        grid_spec=pltpu.PrefetchScalarGridSpec(
            num_scalar_prefetch=0,
            grid=grid,
            in_specs=[
                pl.BlockSpec((C, C), lambda n, s: (0, 0)),   # folded weight, resident
                pl.BlockSpec((C, 1), lambda n, s: (0, 0)),   # folded bias, resident
                pl.BlockSpec((bn, C, hw_tile), lambda n, s: (n, 0, s)),
            ],
            out_specs=pl.BlockSpec((bn, C, hw_tile), lambda n, s: (n, 0, s)),
        ),
        compiler_params=pltpu.CompilerParams(
            # Both axes write disjoint output blocks.  On v7x confirm both
            # TensorCores issue DMAs; if one idles, switch the leading axis to
            # pltpu.CORE_PARALLEL.
            dimension_semantics=("parallel", "parallel"),
            vmem_limit_bytes=vmem_limit,
        ),
        cost_estimate=cost,
    )(w_eff, b_eff, x)

    return out.reshape(N, C, H, W)


def graph_layer_reference(x_nchw, conv_w, conv_b, op_logw):
    """Pure-JAX reference mirroring the PyTorch GraphLayer forward (unfolded)."""
    N, C, H, W = x_nchw.shape
    hi = jax.lax.Precision.HIGHEST
    x_cs = jnp.transpose(x_nchw, (1, 0, 2, 3)).reshape(C, N * H * W)
    ew = jnp.exp(op_logw)

    def edge(e, feat):
        conv = jnp.matmul(conv_w[e], feat, precision=hi) + conv_b[e][:, None]
        return ew[e, 0] * conv + ew[e, 1] * feat

    node0 = x_cs
    node1 = edge(0, node0)
    node2 = edge(1, node0) + edge(2, node1)
    return jnp.transpose(node2.reshape(C, N, H, W), (1, 0, 2, 3))


if __name__ == "__main__":
    N, C, H, W = 2, 4, 16, 16
    num_edges = 3
    num_ops_per_edge = 2
    total_ops = num_edges * num_ops_per_edge  # GraphLayer.num_ops

    key = jax.random.PRNGKey(0)
    kx, kw, kb, kop = jax.random.split(key, 4)

    x = jax.random.normal(kx, (N, C, H, W), dtype=jnp.float32)

    # Conv2d(C, C, kernel_size=1) weights per edge, default-torch-style scale.
    fan_in = C
    bound = 1.0 / math.sqrt(fan_in)
    conv_w = jax.random.uniform(kw, (num_edges, C, C), jnp.float32, -bound, bound)
    conv_b = jax.random.uniform(kb, (num_edges, C), jnp.float32, -bound, bound)

    # _init_op_weights: uniform in [log(stdv/2), log(stdv)], stdv = 1/sqrt(num_ops).
    stdv = 1.0 / math.sqrt(total_ops)
    op_logw = jax.random.uniform(
        kop, (num_edges, num_ops_per_edge), jnp.float32,
        math.log(stdv / 2.0), math.log(stdv),
    )

    ref = graph_layer_reference(x, conv_w, conv_b, op_logw)

    # f32 path: matches the PyTorch reference numerics.
    out = jax.block_until_ready(graph_layer_forward(x, conv_w, conv_b, op_logw))
    assert out.shape == (N, C, H, W)
    assert out.dtype == jnp.float32
    assert jnp.allclose(out, ref, rtol=1e-4, atol=1e-5), "f32 mismatch vs. reference"

    # bf16 I/O path: halves HBM bytes on an HBM-bound kernel (f32 accumulation,
    # f32 bias add), checked at bf16-appropriate tolerance.
    out_bf16 = jax.block_until_ready(
        graph_layer_forward(x.astype(jnp.bfloat16), conv_w, conv_b, op_logw))
    assert out_bf16.dtype == jnp.bfloat16
    assert jnp.allclose(out_bf16.astype(jnp.float32), ref, rtol=3e-2, atol=3e-2), \
        "bf16 mismatch vs. reference"

    print("KERNEL_OK")
</pallas_src>

<mosaic_0001>
module attributes {stable_mosaic.version = 11 : i64} {
  func.func @graph_layer_kernel(%arg0: i32, %arg1: i32, %arg2: memref<4x4xf32, #tpu.memory_space<vmem>>, %arg3: memref<4x1xf32, #tpu.memory_space<vmem>>, %arg4: memref<2x4x256xf32, #tpu.memory_space<vmem>>, %arg5: memref<2x4x256xf32, #tpu.memory_space<vmem>>) attributes {dimension_semantics = [#tpu.dimension_semantics<parallel>, #tpu.dimension_semantics<parallel>], iteration_bounds = array<i64: 1, 1>, scalar_prefetch = 0 : i64, scratch_operands = 0 : i64, tpu.core_type = #tpu.core_type<tc>, window_params = [{pipeline_mode = #tpu.pipeline_mode<synchronous>, transform_indices = @transform_0, window_bounds = array<i64: 4, 4>}, {pipeline_mode = #tpu.pipeline_mode<synchronous>, transform_indices = @transform_1, window_bounds = array<i64: 4, 1>}, {transform_indices = @transform_2, window_bounds = array<i64: 2, 4, 256>}, {transform_indices = @transform_3, window_bounds = array<i64: 2, 4, 256>}]} {
    %c0 = arith.constant 0 : index
    %c0_0 = arith.constant 0 : index
    %0 = vector.load %arg2[%c0, %c0_0] : memref<4x4xf32, #tpu.memory_space<vmem>>, vector<4x4xf32>
    %c0_1 = arith.constant 0 : index
    %c0_2 = arith.constant 0 : index
    %c0_3 = arith.constant 0 : index
    %1 = vector.load %arg4[%c0_1, %c0_2, %c0_3] : memref<2x4x256xf32, #tpu.memory_space<vmem>>, vector<1x4x256xf32>
    %2 = vector.shape_cast %1 : vector<1x4x256xf32> to vector<4x256xf32>
    %cst = arith.constant dense<0.000000e+00> : vector<4x256xf32>
    %3 = tpu.matmul %0, %2, %cst {dimension_numbers = #tpu.dot_dimension_numbers<[1], [0], [0], [1], [0, 0, 1, 1], [], []>, precision = #tpu.contract_precision<fp32>} : vector<4x4xf32>, vector<4x256xf32>, vector<4x256xf32> -> vector<4x256xf32>
    %c0_4 = arith.constant 0 : index
    %c0_5 = arith.constant 0 : index
    %4 = vector.load %arg3[%c0_4, %c0_5] : memref<4x1xf32, #tpu.memory_space<vmem>>, vector<4x1xf32>
    %5 = vector.broadcast %4 : vector<4x1xf32> to vector<4x256xf32>
    %6 = arith.addf %3, %5 : vector<4x256xf32>
    %c0_6 = arith.constant 0 : index
    %c0_7 = arith.constant 0 : index
    %c0_8 = arith.constant 0 : index
    %7 = vector.load %arg5[%c0_6, %c0_7, %c0_8] : memref<2x4x256xf32, #tpu.memory_space<vmem>>, vector<1x4x256xf32>
    %8 = vector.shape_cast %7 : vector<1x4x256xf32> to vector<4x256xf32>
    %9 = vector.shape_cast %6 : vector<4x256xf32> to vector<1x4x256xf32>
    tpu.vector_store %arg5[%c0_6, %c0_7, %c0_8], %9 {strides = array<i32>} : memref<2x4x256xf32, #tpu.memory_space<vmem>>, vector<1x4x256xf32>,
    %c0_9 = arith.constant 0 : index
    %c0_10 = arith.constant 0 : index
    %10 = vector.load %arg2[%c0_9, %c0_10] : memref<4x4xf32, #tpu.memory_space<vmem>>, vector<4x4xf32>
    %c1 = arith.constant 1 : index
    %c0_11 = arith.constant 0 : index
    %c0_12 = arith.constant 0 : index
    %11 = vector.load %arg4[%c1, %c0_11, %c0_12] : memref<2x4x256xf32, #tpu.memory_space<vmem>>, vector<1x4x256xf32>
    %12 = vector.shape_cast %11 : vector<1x4x256xf32> to vector<4x256xf32>
    %cst_13 = arith.constant dense<0.000000e+00> : vector<4x256xf32>
    %13 = tpu.matmul %10, %12, %cst_13 {dimension_numbers = #tpu.dot_dimension_numbers<[1], [0], [0], [1], [0, 0, 1, 1], [], []>, precision = #tpu.contract_precision<fp32>} : vector<4x4xf32>, vector<4x256xf32>, vector<4x256xf32> -> vector<4x256xf32>
    %c0_14 = arith.constant 0 : index
    %c0_15 = arith.constant 0 : index
    %14 = vector.load %arg3[%c0_14, %c0_15] : memref<4x1xf32, #tpu.memory_space<vmem>>, vector<4x1xf32>
    %15 = vector.broadcast %14 : vector<4x1xf32> to vector<4x256xf32>
    %16 = arith.addf %13, %15 : vector<4x256xf32>
    %c1_16 = arith.constant 1 : index
    %c0_17 = arith.constant 0 : index
    %c0_18 = arith.constant 0 : index
    %17 = vector.load %arg5[%c1_16, %c0_17, %c0_18] : memref<2x4x256xf32, #tpu.memory_space<vmem>>, vector<1x4x256xf32>
    %18 = vector.shape_cast %17 : vector<1x4x256xf32> to vector<4x256xf32>
    %19 = vector.shape_cast %16 : vector<4x256xf32> to vector<1x4x256xf32>
    tpu.vector_store %arg5[%c1_16, %c0_17, %c0_18], %19 {strides = array<i32>} : memref<2x4x256xf32, #tpu.memory_space<vmem>>, vector<1x4x256xf32>,
    return
  }
  func.func @transform_0(%arg0: i32, %arg1: i32) -> (i32, i32) {
    %c0_i32 = arith.constant 0 : i32
    %c0_i32_0 = arith.constant 0 : i32
    %c0_i32_1 = arith.constant 0 : i32
    return %c0_i32, %c0_i32_0 : i32, i32
  }
  func.func @transform_1(%arg0: i32, %arg1: i32) -> (i32, i32) {
    %c0_i32 = arith.constant 0 : i32
    %c0_i32_0 = arith.constant 0 : i32
    %c0_i32_1 = arith.constant 0 : i32
    return %c0_i32, %c0_i32_0 : i32, i32
  }
  func.func @transform_2(%arg0: i32, %arg1: i32) -> (i32, i32, i32) {
    %c0_i32 = arith.constant 0 : i32
    %c0_i32_0 = arith.constant 0 : i32
    return %arg0, %c0_i32, %arg1 : i32, i32, i32
  }
  func.func @transform_3(%arg0: i32, %arg1: i32) -> (i32, i32, i32) {
    %c0_i32 = arith.constant 0 : i32
    %c0_i32_0 = arith.constant 0 : i32
    return %arg0, %c0_i32, %arg1 : i32, i32, i32
  }
}

</mosaic_0001>

<bundles_post_ra>
// kernel: tpu_custom_call.1
= control target key start
LH: loop header
LB: loop body
LE: loop exit
PB: predicated region body
PF: predicated region fallthrough
CT: control target
= control target key end

     0   :  { %8 = vsyncpa [#allocation3], 0  ;;  %s1161_s0 = inlined_call_operand.vmem [shape: f32[4,4], index: 0, kind: input, shape index: {}]   ;;  %s1162_s1 = inlined_call_operand.vmem [shape: f32[4,1], index: 1, kind: input, shape index: {}]   ;;  %s1163_s2 = inlined_call_operand.hbm [shape: f32[2,4,256], index: 2, kind: input, shape index: {}]   ;;  %s1164_s3 = inlined_call_operand.hbm [shape: f32[2,4,256], index: 3, kind: output, shape index: {}]  }
   0x1   :  { %9 = vsyncpa [#allocation4], 0  ;;  %s1077_s12 = smov [#allocation2]  }
   0x2   :  { %s19_s13 = sshll.u32 %s1077_s12, 4  ;;  %s20_s13 = int_to_ptr.vmem [resolvable:$true] %s19_s13 }
   0x3   :  { %s1041_s14 = scalar_lea.vmem %s20_s13, 256  ;;  %p1046_p1 = scmp.lt.s32.totalorder %s20_s13, %s20_s13 }
   0x4   :  { %p1042_p0 = scmp.ne.s32.totalorder %s20_s13, %s1041_s14  ;;  %p1047_p2 = scmp.lt.s32.totalorder %s1041_s14, %s1041_s14 }
   0x6   :  { %p1048_p3 = por %p1047_p2, %p1046_p1 }
   0x8   :  { %p1049_p4 = pnand %p1048_p3, %p1042_p0 }
   0xa   :  { %1052 = shalt.err (!%p1049_p4)
}
   0xb   :  { %s1078_s15 = smov 128   ;;  %s1079_s16 = smov 8  }
   0xc   :  { %25 = dma.hbm_to_vmem [thread:$0]  %s1163_s2, 256, %s20_s13, [#allocation3], %s1078_s15, %s1078_s15, %s1079_s16  }
   0xd   :  { %1073 = dma.done.wait [#allocation3], 256  }
   0xe   :  { %1074 = vsyncadd [#allocation3], 4294967040  ;;  %v1080_v0 = vmov 0.0   ;;  %v1081_v1 = vmov 0   ;;  %vm43_vm0 = vcmask 1043456   ;;  %vm39_vm1 = vcmask 31744  }
   0xf   :  { %114 = vmatprep.mubr.f32.mxu0 %v1080_v0  ;;  %200 = vmatprep.mubr.f32.mxu1 %v1080_v0  ;;  %v30_v2 = vld [vmem:[#allocation2] sm:$0xff]  ;;  %v520_v9 = vld [vmem:[#allocation2 + $0x8] sm:$0xff] }
  0x10   :  { %1030 = vset.pattern.permute.xlu0 %v1081_v1  ;;  %v29_v3 = vld [vmem:[%s1161_s0] sm:$0xf]  ;;  %v38_v5 = vcombine.high %v30_v2, %v30_v2  ;;  %v44_v6 = vsel %vm43_vm0, %v30_v2, 0  ;;  %v528_v13 = vcombine.high %v520_v9, %v520_v9  ;;  %v532_v16 = vsel %vm43_vm0, %v520_v9, 0 }
  0x11   :  { %v518_v4 = vld [vmem:[%s1161_s0] sm:$0xf]  ;;  %v41_v7 = vsel %vm39_vm1, %v29_v3, 0  ;;  %v80_v11 = vand.u32 4294901760, %v44_v6  ;;  %v1131_v23 = vand.u32 4294901760, %v532_v16 }
  0x12   :  { %v530_v8 = vsel %vm39_vm1, %v518_v4, 0  ;;  %v31_v10 = vld [vmem:[%s1162_s1] sm:$0xf]  ;;  %v115_v12 = vand.u32 4294901760, %v41_v7  ;;  %v46_v14 = vsel %vm43_vm0, %v38_v5, 0  ;;  %v534_v21 = vsel %vm43_vm0, %v528_v13, 0 }
  0x13   :  { %34 = vperm.xlu0 %1030, %v31_v10   ;;  %v1122_v15 = vand.u32 4294901760, %v530_v8  ;;  %v521_v17 = vld [vmem:[%s1162_s1] sm:$0xf]  ;;  %v78_v18 = vand.u32 4294901760, %v46_v14  ;;  %v163_v20 = vsub.f32 %v44_v6, %v80_v11  ;;  %v1129_v22 = vand.u32 4294901760, %v534_v21  ;;  %s1082_s1 = smov [#allocation5]  }
  0x14   :  { %v116_v19 = vsub.f32 %v41_v7, %v115_v12  ;;  %v651_v32 = vsub.f32 %v532_v16, %v1131_v23  ;;  %s1012_s25 = sshll.u32 %s1082_s1, 4  ;;  %s1013_s25 = int_to_ptr.vmem [resolvable:$true] %s1012_s25 }
  0x15   :  { %79 = vmatprep.subr.mxu0 %v78_v18  ;;  %v157_v25 = vsub.f32 %v46_v14, %v78_v18  ;;  %v164_v26 = vand.u32 4294901760, %v163_v20  ;;  %v645_v27 = vsub.f32 %v534_v21, %v1129_v22  ;;  %v604_v31 = vsub.f32 %v530_v8, %v1122_v15  ;;  %s1053_s26 = scalar_lea.vmem %s1013_s25, 256  ;;  %p1058_p6 = scmp.lt.s32.totalorder %s1013_s25, %s1013_s25 }
  0x16   :  { %v117_v24 = vand.u32 4294901760, %v116_v19  ;;  %81 = vmatpush1.msra.mxu0 %v80_v11  ;;  %v652_v39 = vand.u32 4294901760, %v651_v32  ;;  %p1054_p5 = scmp.ne.s32.totalorder %s1013_s25, %s1053_s26  ;;  %p1059_p7 = scmp.lt.s32.totalorder %s1053_s26, %s1053_s26 }
  0x17   :  { %524 = vperm.xlu0 %1030, %v521_v17   ;;  %v158_v29 = vand.u32 4294901760, %v157_v25  ;;  %240 = vmatprep.subr.mxu0 %v157_v25  ;;  %v165_v30 = vsub.f32 %v163_v20, %v164_v26  ;;  %v646_v36 = vand.u32 4294901760, %v645_v27  ;;  %v605_v38 = vand.u32 4294901760, %v604_v31 }
  0x18   :  { %v118_v28 = vsub.f32 %v116_v19, %v117_v24  ;;  %v653_v42 = vsub.f32 %v651_v32, %v652_v39  ;;  %p1060_p8 = por %p1059_p7, %p1058_p6 }
  0x19   :  { %v159_v34 = vsub.f32 %v157_v25, %v158_v29  ;;  %v166_v35 = vand.u32 4294901760, %v165_v30  ;;  %v647_v40 = vsub.f32 %v645_v27, %v646_v36  ;;  %v606_v41 = vsub.f32 %v604_v31, %v605_v38 }
  0x1a   :  { %v119_v33 = vand.u32 4294901760, %v118_v28  ;;  %v654_v45 = vand.u32 4294901760, %v653_v42  ;;  %p1061_p9 = pnand %p1060_p8, %p1054_p5 }
  0x1b   :  { %v160_v37 = vand.u32 4294901760, %v159_v34  ;;  %v648_v43 = vand.u32 4294901760, %v647_v40  ;;  %v607_v44 = vand.u32 4294901760, %v606_v41 }
  0x1c   :  { %120 = vmatmul.mubr.f32.vlgmr.msra.gmra.mxu0 %v119_v33 }
  0x1d   :  { %243 = vmatpush1.msra.mxu0 %v163_v20  ;;  %276 = vmatprep.mubr.f32.mxu0 %v1080_v0 }
  0x1e   :  { %161 = vmatprep.subr.mxu1 %v160_v37  ;;  %394 = vmatprep.subr.mxu0 %v158_v29 }
  0x1f   :  { %167 = vmatpush1.msra.mxu1 %v166_v35 }
  0x20   :  { %202 = vmatmul.mubr.f32.vlgmr.msra.gmra.mxu1 %v115_v12  ;;  %279 = vmatmul.mubr.f32.vlgmr.msra.gmra.mxu0 %v116_v19 }
  0x21   :  { %316 = vmatprep.subr.mxu1 %v78_v18  ;;  %351 = vmatprep.mubr.f32.mxu1 %v1080_v0 }
  0x22   :  { %318 = vmatpush1.msra.mxu1 %v80_v11  ;;  %398 = vmatpush1.msra.mxu0 %v164_v26 }
  0x23   :  { %431 = vmatprep.mubr.f32.mxu0 %v1080_v0  ;;  %470 = vmatprep.subr.mxu1 %v78_v18 }
  0x24   :  { %355 = vmatmul.mubr.f32.vlgmr.msra.gmra.mxu1 %v117_v24  ;;  %433 = vmatmul.mubr.f32.vlgmr.msra.gmra.mxu0 %v115_v12 }
  0x25   :  { %472 = vmatpush1.msra.mxu1 %v80_v11  ;;  %567 = vmatprep.subr.mxu0 %v1129_v22 }
  0x26   :  { %505 = vmatprep.mubr.f32.mxu1 %v1080_v0  ;;  %569 = vmatpush1.msra.mxu0 %v1131_v23 }
  0x27   :  { %602 = vmatprep.mubr.f32.mxu0 %v1080_v0  ;;  %649 = vmatprep.subr.mxu1 %v648_v43 }
  0x28   :  { %507 = vmatmul.mubr.f32.vlgmr.msra.gmra.mxu1 %v115_v12  ;;  %608 = vmatmul.mubr.f32.vlgmr.msra.gmra.mxu0 %v607_v44 }
  0x29   :  { %655 = vmatpush1.msra.mxu1 %v654_v45  ;;  %728 = vmatprep.subr.mxu0 %v645_v27 }
  0x2a   :  { %688 = vmatprep.mubr.f32.mxu1 %v1080_v0  ;;  %731 = vmatpush1.msra.mxu0 %v651_v32 }
  0x2b   :  { %764 = vmatprep.mubr.f32.mxu0 %v1080_v0  ;;  %804 = vmatprep.subr.mxu1 %v1129_v22 }
  0x2c   :  { %690 = vmatmul.mubr.f32.vlgmr.msra.gmra.mxu1 %v1122_v15  ;;  %767 = vmatmul.mubr.f32.vlgmr.msra.gmra.mxu0 %v604_v31 }
  0x2d   :  { %806 = vmatpush1.msra.mxu1 %v1131_v23  ;;  %882 = vmatprep.subr.mxu0 %v646_v36 }
  0x2e   :  { %839 = vmatprep.mubr.f32.mxu1 %v1080_v0  ;;  %886 = vmatpush1.msra.mxu0 %v652_v39 }
  0x2f   :  { %919 = vmatprep.mubr.f32.mxu0 %v1080_v0  ;;  %958 = vmatprep.subr.mxu1 %v1129_v22 }
  0x30   :  { %843 = vmatmul.mubr.f32.vlgmr.msra.gmra.mxu1 %v605_v38  ;;  %921 = vmatmul.mubr.f32.vlgmr.msra.gmra.mxu0 %v1122_v15 }
  0x31   :  { %960 = vmatpush1.msra.mxu1 %v1131_v23  ;;  %993 = vmatprep.mubr.f32.mxu1 %v1080_v0 }
  0x34   :  { %995 = vmatmul.mubr.f32.vlgmr.msra.gmra.mxu1 %v1122_v15 }
  0x8e   :  { %v35_v46 = vpop.permute.xlu0 %34 }
  0x92   :  { %v525_v2 = vpop.permute.xlu0 %524 }
  0xdc   :  { %v121_v47 = vpop.f32.mrf.mxu0 }
  0xdd   :  { %v122_v48 = vadd.f32 %v121_v47, %v35_v46 }
  0xde   :  { %v123_v49 = vpop.f32.mrf.mxu0 }
  0xdf   :  { %v124_v52 = vadd.f32 %v123_v49, %v35_v46 }
  0xe0   :  { %v203_v50 = vpop.f32.mrf.mxu1  ;;  %v280_v51 = vpop.f32.mrf.mxu0 }
  0xe1   :  { %v204_v53 = vadd.f32 %v203_v50, %v122_v48 }
  0xe2   :  { %v205_v54 = vpop.f32.mrf.mxu1  ;;  %v282_v55 = vpop.f32.mrf.mxu0 }
  0xe3   :  { %v281_v56 = vadd.f32 %v280_v51, %v204_v53  ;;  %v206_v57 = vadd.f32 %v205_v54, %v124_v52 }
  0xe4   :  { %v356_v58 = vpop.f32.mrf.mxu1  ;;  %v434_v59 = vpop.f32.mrf.mxu0 }
  0xe5   :  { %v283_v60 = vadd.f32 %v282_v55, %v206_v57  ;;  %v357_v61 = vadd.f32 %v356_v58, %v281_v56 }
  0xe6   :  { %v358_v62 = vpop.f32.mrf.mxu1  ;;  %v436_v63 = vpop.f32.mrf.mxu0 }
  0xe7   :  { %v435_v0 = vadd.f32 %v434_v59, %v357_v61  ;;  %v359_v1 = vadd.f32 %v358_v62, %v283_v60 }
  0xe8   :  { %v508_v3 = vpop.f32.mrf.mxu1  ;;  %v609_v4 = vpop.f32.mrf.mxu0 }
  0xe9   :  { %v437_v5 = vadd.f32 %v436_v63, %v359_v1  ;;  %v509_v8 = vadd.f32 %v508_v3, %v435_v0  ;;  %v610_v9 = vadd.f32 %v609_v4, %v525_v2 }
  0xea   :  { %v510_v6 = vpop.f32.mrf.mxu1  ;;  %v611_v7 = vpop.f32.mrf.mxu0 }
  0xeb   :  { %v511_v10 = vadd.f32 %v510_v6, %v437_v5  ;;  %v612_v14 = vadd.f32 %v611_v7, %v525_v2 }
  0xec   :  { %v691_v11 = vpop.f32.mrf.mxu1  ;;  %v768_v12 = vpop.f32.mrf.mxu0 }
  0xed   :  { %v515_v13 = vcombine.low %v509_v8, %v511_v10  ;;  %v692_v15 = vadd.f32 %v691_v11, %v610_v9 }
  0xee   :  { %v693_v16 = vpop.f32.mrf.mxu1  ;;  %v770_v17 = vpop.f32.mrf.mxu0 }
  0xef   :  { %517 = vst [vmem:[#allocation5] sm:$0xff] %v515_v13  ;;  %v769_v18 = vadd.f32 %v768_v12, %v692_v15  ;;  %v694_v19 = vadd.f32 %v693_v16, %v612_v14 }
  0xf0   :  { %v844_v20 = vpop.f32.mrf.mxu1  ;;  %v922_v21 = vpop.f32.mrf.mxu0 }
  0xf1   :  { %v771_v22 = vadd.f32 %v770_v17, %v694_v19  ;;  %v845_v23 = vadd.f32 %v844_v20, %v769_v18 }
  0xf2   :  { %v846_v24 = vpop.f32.mrf.mxu1  ;;  %v924_v27 = vpop.f32.mrf.mxu0 }
  0xf3   :  { %v923_v25 = vadd.f32 %v922_v21, %v845_v23  ;;  %v847_v26 = vadd.f32 %v846_v24, %v771_v22 }
  0xf4   :  { %v996_v28 = vpop.f32.mrf.mxu1 }
  0xf5   :  { %v925_v29 = vadd.f32 %v924_v27, %v847_v26  ;;  %v997_v31 = vadd.f32 %v996_v28, %v923_v25 }
  0xf6   :  { %v998_v30 = vpop.f32.mrf.mxu1 }
  0xf7   :  { %v999_v32 = vadd.f32 %v998_v30, %v925_v29 }
  0xf9   :  { %v1003_v33 = vcombine.low %v997_v31, %v999_v32 }
  0xfb   :  { %1006 = vst [vmem:[#allocation5 + $0x8] sm:$0xff] %v1003_v33 }
  0xfc   :  { %1064 = shalt.err (!%p1061_p9)
}
  0xfd   :  { %1018 = dma.vmem_to_hbm [thread:$0]  %s1013_s25, 256, %s1164_s3, [#allocation4], %s1078_s15, %s1078_s15, %s1079_s16  }
  0xfe   :  { %1075 = dma.done.wait [#allocation4], 256  }
  0xff   :  { %1076 = vsyncadd [#allocation4], 4294967040 }
 0x100   :  { %1022 = vsyncpa [#allocation3], 1 }
 0x101   :  { %1023 = vsyncpa [#allocation4], 1 }

</bundles_post_ra>
